<compile_context>
chip_gen: v7x
topology: tpu7x:2x2x1
jax: 0.10.0
libtpu: 0.0.40
codegen_flags: <defaults>
</compile_context>

<pallas_src>
import jax
import jax.numpy as jnp
from jax.experimental import pallas as pl
from jax.experimental.pallas import tpu as pltpu


def _round_up(x, m):
    return (x + m - 1) // m * m


def swiglu_kernel(x_ref, w1_ref, w2_ref, b1_ref, b2_ref, o_ref, acc_a, acc_b):
    """acc_a += x @ W1_tile; acc_b += x @ W2_tile; SwiGLU epilogue on last K step."""
    k = pl.program_id(2)

    @pl.when(k == 0)
    def _init():
        # Fold the biases into the accumulator init — applied exactly once per tile.
        acc_a[...] = jnp.broadcast_to(b1_ref[...].astype(jnp.float32), acc_a.shape)
        acc_b[...] = jnp.broadcast_to(b2_ref[...].astype(jnp.float32), acc_b.shape)

    x = x_ref[...]  # bf16 tile, loaded once, feeds both MXU dots
    acc_a[...] += jnp.dot(x, w1_ref[...], preferred_element_type=jnp.float32)
    acc_b[...] += jnp.dot(x, w2_ref[...], preferred_element_type=jnp.float32)

    @pl.when(k == pl.num_programs(2) - 1)
    def _finalize():
        # Read halves straight from the scratch refs (no big live f32 temporary).
        a = acc_a[...]
        b = acc_b[...]
        # sigmoid via EUP-friendly exp + approx reciprocal (divide off the VPU).
        gate = b * pl.reciprocal(1.0 + jnp.exp(-b), approx=True)
        o_ref[...] = (a * gate).astype(o_ref.dtype)


def swiglu(x, w1, b1, w2, b2, *, block_m=512, block_n=512, block_k=1024,
           vmem_limit_bytes=56 * 1024 * 1024):
    """x: (B, D_in); w1/w2: (D_in, H); b1/b2: (1, H)  ->  (B, H)."""
    B, D_in = x.shape
    H = w1.shape[1]
    out_dtype = x.dtype

    # MXU / lane-aligned tile sizes, clamped for small problems.
    # bm is a multiple of 16 (bf16 sublane packing), bn/bk multiples of 128.
    bm = min(block_m, _round_up(B, 16))
    bn = min(block_n, _round_up(H, 128))
    bk = min(block_k, _round_up(D_in, 128))

    Bp = _round_up(B, bm)
    Hp = _round_up(H, bn)
    Kp = _round_up(D_in, bk)

    # Zero-pad to tile multiples and cast MXU operands to bf16 (f32 accumulation in
    # the kernel).  Padding with zeros contributes nothing to the K reduction.
    x_p = jnp.pad(x, ((0, Bp - B), (0, Kp - D_in))).astype(jnp.bfloat16)
    w1_p = jnp.pad(w1, ((0, Kp - D_in), (0, Hp - H))).astype(jnp.bfloat16)
    w2_p = jnp.pad(w2, ((0, Kp - D_in), (0, Hp - H))).astype(jnp.bfloat16)
    b1_p = jnp.pad(b1, ((0, 0), (0, Hp - H))).astype(jnp.float32)
    b2_p = jnp.pad(b2, ((0, 0), (0, Hp - H))).astype(jnp.float32)

    grid = (Bp // bm, Hp // bn, Kp // bk)

    out_p = pl.pallas_call(
        swiglu_kernel,
        out_shape=jax.ShapeDtypeStruct((Bp, Hp), out_dtype),
        grid_spec=pltpu.PrefetchScalarGridSpec(
            num_scalar_prefetch=0,
            grid=grid,
            in_specs=[
                pl.BlockSpec((bm, bk), lambda i, j, k: (i, k)),  # x tile
                pl.BlockSpec((bk, bn), lambda i, j, k: (k, j)),  # W1 tile
                pl.BlockSpec((bk, bn), lambda i, j, k: (k, j)),  # W2 tile
                pl.BlockSpec((1, bn), lambda i, j, k: (0, j)),   # bias1 tile
                pl.BlockSpec((1, bn), lambda i, j, k: (0, j)),   # bias2 tile
            ],
            out_specs=pl.BlockSpec((bm, bn), lambda i, j, k: (i, j)),
            scratch_shapes=[
                pltpu.VMEM((bm, bn), jnp.float32),  # acc_a
                pltpu.VMEM((bm, bn), jnp.float32),  # acc_b
            ],
        ),
        compiler_params=pltpu.CompilerParams(
            dimension_semantics=("parallel", "parallel", "arbitrary"),
            vmem_limit_bytes=vmem_limit_bytes,
        ),
    )(x_p, w1_p, w2_p, b1_p, b2_p)

    return out_p[:B, :H]


def _reference(x, w1, b1, w2, b2):
    a = x @ w1 + b1
    b = x @ w2 + b2
    return a * (b * jax.nn.sigmoid(b))


def _make_inputs(key, batch, input_dim, hidden_dim):
    kx, kw1, kb1, kw2, kb2 = jax.random.split(key, 5)
    # Deterministic init mimicking nn.Linear's uniform(-1/sqrt(in), 1/sqrt(in)).
    bound = 1.0 / jnp.sqrt(jnp.float32(input_dim))
    x = jax.random.normal(kx, (batch, input_dim), dtype=jnp.float32)
    w1 = jax.random.uniform(kw1, (input_dim, hidden_dim), jnp.float32, -bound, bound)
    b1 = jax.random.uniform(kb1, (1, hidden_dim), jnp.float32, -bound, bound)
    w2 = jax.random.uniform(kw2, (input_dim, hidden_dim), jnp.float32, -bound, bound)
    b2 = jax.random.uniform(kb2, (1, hidden_dim), jnp.float32, -bound, bound)
    return x, w1, b1, w2, b2


if __name__ == "__main__":
    # Test 1: small shapes consistent with SwiGLU(input_dim, hidden_dim) on a batch
    # of vectors (single grid step per axis).
    x, w1, b1, w2, b2 = _make_inputs(jax.random.PRNGKey(0), 16, 32, 64)
    out = jax.block_until_ready(swiglu(x, w1, b1, w2, b2))
    ref = _reference(x, w1, b1, w2, b2)
    assert out.shape == (16, 64)
    # bf16 MXU operands -> relaxed tolerance.
    assert jnp.allclose(out, ref, atol=2e-2, rtol=2e-2)

    # Test 2: ragged dims + small block overrides so the (M, N, K) grid,
    # K-accumulation, padding, and bias-applied-once logic are exercised
    # (grid = (2, 2, 3)).
    x2, w1b, b1b, w2b, b2b = _make_inputs(jax.random.PRNGKey(1), 24, 320, 200)
    out2 = jax.block_until_ready(
        swiglu(x2, w1b, b1b, w2b, b2b, block_m=16, block_n=128, block_k=128))
    ref2 = _reference(x2, w1b, b1b, w2b, b2b)
    assert out2.shape == (24, 200)
    assert jnp.allclose(out2, ref2, atol=2e-2, rtol=2e-2)

    print("KERNEL_OK")
</pallas_src>

<mosaic_0001>
module attributes {stable_mosaic.version = 11 : i64} {
  func.func @swiglu_kernel(%arg0: i32, %arg1: i32, %arg2: i32, %arg3: memref<16x128xbf16, #tpu.memory_space<vmem>>, %arg4: memref<128x128xbf16, #tpu.memory_space<vmem>>, %arg5: memref<128x128xbf16, #tpu.memory_space<vmem>>, %arg6: memref<1x128xf32, #tpu.memory_space<vmem>>, %arg7: memref<1x128xf32, #tpu.memory_space<vmem>>, %arg8: memref<16x128xf32, #tpu.memory_space<vmem>>, %arg9: memref<16x128xf32, #tpu.memory_space<vmem>>, %arg10: memref<16x128xf32, #tpu.memory_space<vmem>>) attributes {dimension_semantics = [#tpu.dimension_semantics<parallel>, #tpu.dimension_semantics<parallel>, #tpu.dimension_semantics<arbitrary>], iteration_bounds = array<i64: 1, 1, 1>, scalar_prefetch = 0 : i64, scratch_operands = 2 : i64, tpu.core_type = #tpu.core_type<tc>, window_params = [{transform_indices = @transform_0, window_bounds = array<i64: 16, 128>}, {transform_indices = @transform_1, window_bounds = array<i64: 128, 128>}, {transform_indices = @transform_2, window_bounds = array<i64: 128, 128>}, {transform_indices = @transform_3, window_bounds = array<i64: 1, 128>}, {transform_indices = @transform_4, window_bounds = array<i64: 1, 128>}, {transform_indices = @transform_5, window_bounds = array<i64: 16, 128>}]} {
    %c0_i32 = arith.constant 0 : i32
    %0 = arith.cmpi eq, %arg2, %c0_i32 : i32
    %1 = arith.extui %0 : i1 to i32
    %c0_i32_0 = arith.constant 0 : i32
    %2 = arith.cmpi ne, %1, %c0_i32_0 : i32
    scf.if %2 {
      %c0_17 = arith.constant 0 : index
      %c0_18 = arith.constant 0 : index
      %17 = vector.load %arg6[%c0_17, %c0_18] : memref<1x128xf32, #tpu.memory_space<vmem>>, vector<1x128xf32>
      %18 = vector.shape_cast %17 : vector<1x128xf32> to vector<1x128xf32>
      %19 = vector.broadcast %18 : vector<1x128xf32> to vector<16x128xf32>
      %c0_19 = arith.constant 0 : index
      %c0_20 = arith.constant 0 : index
      %20 = vector.load %arg9[%c0_19, %c0_20] : memref<16x128xf32, #tpu.memory_space<vmem>>, vector<16x128xf32>
      tpu.vector_store %arg9[%c0_19, %c0_20], %19 {strides = array<i32>} : memref<16x128xf32, #tpu.memory_space<vmem>>, vector<16x128xf32>,
      %c0_21 = arith.constant 0 : index
      %c0_22 = arith.constant 0 : index
      %21 = vector.load %arg7[%c0_21, %c0_22] : memref<1x128xf32, #tpu.memory_space<vmem>>, vector<1x128xf32>
      %22 = vector.shape_cast %21 : vector<1x128xf32> to vector<1x128xf32>
      %23 = vector.broadcast %22 : vector<1x128xf32> to vector<16x128xf32>
      %c0_23 = arith.constant 0 : index
      %c0_24 = arith.constant 0 : index
      %24 = vector.load %arg10[%c0_23, %c0_24] : memref<16x128xf32, #tpu.memory_space<vmem>>, vector<16x128xf32>
      tpu.vector_store %arg10[%c0_23, %c0_24], %23 {strides = array<i32>} : memref<16x128xf32, #tpu.memory_space<vmem>>, vector<16x128xf32>,
    } else {
    }
    %c0 = arith.constant 0 : index
    %c0_1 = arith.constant 0 : index
    %3 = vector.load %arg3[%c0, %c0_1] : memref<16x128xbf16, #tpu.memory_space<vmem>>, vector<16x128xbf16>
    %c0_2 = arith.constant 0 : index
    %c0_3 = arith.constant 0 : index
    %4 = vector.load %arg9[%c0_2, %c0_3] : memref<16x128xf32, #tpu.memory_space<vmem>>, vector<16x128xf32>
    %c0_4 = arith.constant 0 : index
    %c0_5 = arith.constant 0 : index
    %5 = vector.load %arg4[%c0_4, %c0_5] : memref<128x128xbf16, #tpu.memory_space<vmem>>, vector<128x128xbf16>
    %cst = arith.constant dense<0.000000e+00> : vector<16x128xf32>
    %6 = tpu.matmul %3, %5, %cst {dimension_numbers = #tpu.dot_dimension_numbers<[1], [0], [0], [1], [0, 0, 1, 1], [], []>} : vector<16x128xbf16>, vector<128x128xbf16>, vector<16x128xf32> -> vector<16x128xf32>
    %7 = arith.addf %4, %6 : vector<16x128xf32>
    %c0_6 = arith.constant 0 : index
    %c0_7 = arith.constant 0 : index
    %8 = vector.load %arg9[%c0_6, %c0_7] : memref<16x128xf32, #tpu.memory_space<vmem>>, vector<16x128xf32>
    tpu.vector_store %arg9[%c0_6, %c0_7], %7 {strides = array<i32>} : memref<16x128xf32, #tpu.memory_space<vmem>>, vector<16x128xf32>,
    %c0_8 = arith.constant 0 : index
    %c0_9 = arith.constant 0 : index
    %9 = vector.load %arg10[%c0_8, %c0_9] : memref<16x128xf32, #tpu.memory_space<vmem>>, vector<16x128xf32>
    %c0_10 = arith.constant 0 : index
    %c0_11 = arith.constant 0 : index
    %10 = vector.load %arg5[%c0_10, %c0_11] : memref<128x128xbf16, #tpu.memory_space<vmem>>, vector<128x128xbf16>
    %cst_12 = arith.constant dense<0.000000e+00> : vector<16x128xf32>
    %11 = tpu.matmul %3, %10, %cst_12 {dimension_numbers = #tpu.dot_dimension_numbers<[1], [0], [0], [1], [0, 0, 1, 1], [], []>} : vector<16x128xbf16>, vector<128x128xbf16>, vector<16x128xf32> -> vector<16x128xf32>
    %12 = arith.addf %9, %11 : vector<16x128xf32>
    %c0_13 = arith.constant 0 : index
    %c0_14 = arith.constant 0 : index
    %13 = vector.load %arg10[%c0_13, %c0_14] : memref<16x128xf32, #tpu.memory_space<vmem>>, vector<16x128xf32>
    tpu.vector_store %arg10[%c0_13, %c0_14], %12 {strides = array<i32>} : memref<16x128xf32, #tpu.memory_space<vmem>>, vector<16x128xf32>,
    %c0_i32_15 = arith.constant 0 : i32
    %14 = arith.cmpi eq, %arg2, %c0_i32_15 : i32
    %15 = arith.extui %14 : i1 to i32
    %c0_i32_16 = arith.constant 0 : i32
    %16 = arith.cmpi ne, %15, %c0_i32_16 : i32
    scf.if %16 {
      %c0_17 = arith.constant 0 : index
      %c0_18 = arith.constant 0 : index
      %17 = vector.load %arg9[%c0_17, %c0_18] : memref<16x128xf32, #tpu.memory_space<vmem>>, vector<16x128xf32>
      %c0_19 = arith.constant 0 : index
      %c0_20 = arith.constant 0 : index
      %18 = vector.load %arg10[%c0_19, %c0_20] : memref<16x128xf32, #tpu.memory_space<vmem>>, vector<16x128xf32>
      %cst_21 = arith.constant 0.000000e+00 : f32
      %19 = vector.broadcast %cst_21 : f32 to vector<16x128xf32>
      %20 = arith.subf %19, %18 : vector<16x128xf32>
      %21 = math.exp %20 : vector<16x128xf32>
      %cst_22 = arith.constant 1.000000e+00 : f32
      %22 = vector.broadcast %cst_22 : f32 to vector<16x128xf32>
      %23 = arith.addf %22, %21 : vector<16x128xf32>
      %24 = tpu.reciprocal %23 {approx = true} : vector<16x128xf32> -> vector<16x128xf32>
      %25 = arith.mulf %18, %24 : vector<16x128xf32>
      %26 = arith.mulf %17, %25 : vector<16x128xf32>
      %c0_23 = arith.constant 0 : index
      %c0_24 = arith.constant 0 : index
      %27 = vector.load %arg8[%c0_23, %c0_24] : memref<16x128xf32, #tpu.memory_space<vmem>>, vector<16x128xf32>
      tpu.vector_store %arg8[%c0_23, %c0_24], %26 {strides = array<i32>} : memref<16x128xf32, #tpu.memory_space<vmem>>, vector<16x128xf32>,
    } else {
    }
    return
  }
  func.func @transform_0(%arg0: i32, %arg1: i32, %arg2: i32) -> (i32, i32) {
    %c0_i32 = arith.constant 0 : i32
    return %arg0, %arg2 : i32, i32
  }
  func.func @transform_1(%arg0: i32, %arg1: i32, %arg2: i32) -> (i32, i32) {
    %c0_i32 = arith.constant 0 : i32
    return %arg2, %arg1 : i32, i32
  }
  func.func @transform_2(%arg0: i32, %arg1: i32, %arg2: i32) -> (i32, i32) {
    %c0_i32 = arith.constant 0 : i32
    return %arg2, %arg1 : i32, i32
  }
  func.func @transform_3(%arg0: i32, %arg1: i32, %arg2: i32) -> (i32, i32) {
    %c0_i32 = arith.constant 0 : i32
    %c0_i32_0 = arith.constant 0 : i32
    return %c0_i32, %arg1 : i32, i32
  }
  func.func @transform_4(%arg0: i32, %arg1: i32, %arg2: i32) -> (i32, i32) {
    %c0_i32 = arith.constant 0 : i32
    %c0_i32_0 = arith.constant 0 : i32
    return %c0_i32, %arg1 : i32, i32
  }
  func.func @transform_5(%arg0: i32, %arg1: i32, %arg2: i32) -> (i32, i32) {
    %c0_i32 = arith.constant 0 : i32
    return %arg0, %arg1 : i32, i32
  }
}

</mosaic_0001>

<bundles_post_ra>
// kernel: tpu_custom_call.1
= control target key start
LH: loop header
LB: loop body
LE: loop exit
PB: predicated region body
PF: predicated region fallthrough
CT: control target
= control target key end

     0   :  { %10 = vsyncpa [#allocation5], 0  ;;  %s672_s0 = inlined_call_operand.hbm [shape: bf16[16,128], index: 0, kind: input, shape index: {}]   ;;  %s673_s1 = inlined_call_operand.hbm [shape: bf16[128,128], index: 1, kind: input, shape index: {}]   ;;  %s674_s2 = inlined_call_operand.hbm [shape: bf16[128,128], index: 2, kind: input, shape index: {}]   ;;  %s675_s3 = inlined_call_operand.vmem [shape: f32[1,128], index: 3, kind: input, shape index: {}]   ;;  %s676_s4 = inlined_call_operand.vmem [shape: f32[1,128], index: 4, kind: input, shape index: {}]   ;;  %s677_s5 = inlined_call_operand.hbm [shape: f32[16,128], index: 5, kind: output, shape index: {}]  }
   0x1   :  { %11 = vsyncpa [#allocation8], 0 }
   0x2   :  { %12 = vsyncpa [#allocation6], 0  ;;  %s562_s18 = smov [#allocation7]   ;;  %s563_s20 = smov [#allocation4]  }
   0x3   :  { %s30_s19 = sshll.u32 %s562_s18, 4  ;;  %s18_s21 = sshll.u32 %s563_s20, 4  ;;  %s31_s19 = int_to_ptr.vmem [resolvable:$true] %s30_s19  ;;  %s602_s21 = int_to_ptr.vmem [resolvable:$true] %s18_s21 }
   0x4   :  { %s468_s24 = scalar_lea.hbm %s673_s1, 1024 }
   0x5   :  { %p469_p0 = scmp.ne.s32.totalorder %s673_s1, %s468_s24  ;;  %p472_p1 = scmp.lt.u32.totalorder %s468_s24, %s673_s1 }
   0x7   :  { %p474_p2 = pnand %p472_p1, %p469_p0 }
   0x9   :  { %477 = shalt.err (!%p474_p2)
}
   0xa   :  { %s478_s29 = scalar_lea.vmem %s31_s19, 1024  ;;  %p483_p4 = scmp.lt.s32.totalorder %s31_s19, %s31_s19 }
   0xb   :  { %p479_p3 = scmp.ne.s32.totalorder %s31_s19, %s478_s29  ;;  %p484_p5 = scmp.lt.s32.totalorder %s478_s29, %s478_s29 }
   0xd   :  { %p485_p6 = por %p484_p5, %p483_p4 }
   0xf   :  { %p486_p7 = pnand %p485_p6, %p479_p3 }
  0x11   :  { %489 = shalt.err (!%p486_p7)
}
  0x12   :  { %s564_s30 = smov 64   ;;  %s565_s6 = smov 4  }
  0x13   :  { %36 = dma.hbm_to_vmem [thread:$0]  %s673_s1, 1024, %s31_s19, [#allocation8], %s564_s30, %s564_s30, %s565_s6  }
  0x14   :  { %s490_s11 = scalar_lea.hbm %s672_s0, 128 }
  0x15   :  { %p491_p8 = scmp.ne.s32.totalorder %s672_s0, %s490_s11  ;;  %p494_p9 = scmp.lt.u32.totalorder %s490_s11, %s672_s0 }
  0x17   :  { %p496_p10 = pnand %p494_p9, %p491_p8 }
  0x19   :  { %499 = shalt.err (!%p496_p10)
}
  0x1a   :  { %s500_s16 = scalar_lea.vmem %s602_s21, 128  ;;  %p505_p12 = scmp.lt.s32.totalorder %s602_s21, %s602_s21 }
  0x1b   :  { %p501_p11 = scmp.ne.s32.totalorder %s602_s21, %s500_s16  ;;  %p506_p13 = scmp.lt.s32.totalorder %s500_s16, %s500_s16 }
  0x1d   :  { %p507_p0 = por %p506_p13, %p505_p12 }
  0x1f   :  { %p508_p1 = pnand %p507_p0, %p501_p11 }
  0x21   :  { %511 = shalt.err (!%p508_p1)
}
  0x22   :  { %24 = dma.hbm_to_vmem [thread:$0]  %s672_s0, 128, %s602_s21, [#allocation5], %s564_s30, %s564_s30, %s565_s6  }
  0x23   :  { %s566_s18 = smov [#allocation9]   ;;  %s512_s23 = scalar_lea.hbm %s674_s2, 1024 }
  0x24   :  { %s42_s19 = sshll.u32 %s566_s18, 4  ;;  %p513_p2 = scmp.ne.s32.totalorder %s674_s2, %s512_s23  ;;  %s43_s19 = int_to_ptr.vmem [resolvable:$true] %s42_s19 }
  0x25   :  { %p516_p3 = scmp.lt.u32.totalorder %s512_s23, %s674_s2 }
  0x27   :  { %p518_p4 = pnand %p516_p3, %p513_p2 }
  0x29   :  { %521 = shalt.err (!%p518_p4)
}
  0x2a   :  { %s522_s28 = scalar_lea.vmem %s43_s19, 1024  ;;  %p527_p6 = scmp.lt.s32.totalorder %s43_s19, %s43_s19 }
  0x2b   :  { %p523_p5 = scmp.ne.s32.totalorder %s43_s19, %s522_s28  ;;  %p528_p7 = scmp.lt.s32.totalorder %s522_s28, %s522_s28 }
  0x2d   :  { %p529_p8 = por %p528_p7, %p527_p6 }
  0x2f   :  { %p530_p9 = pnand %p529_p8, %p523_p5 }
  0x31   :  { %533 = shalt.err (!%p530_p9)
}
  0x32   :  { %48 = dma.hbm_to_vmem [thread:$0]  %s674_s2, 1024, %s43_s19, [#allocation8], %s564_s30, %s564_s30, %s565_s6  }
  0x33   :  { %556 = dma.done.wait [#allocation5], 128  }
  0x34   :  { %557 = vsyncadd [#allocation5], 4294967168 }
  0x35   :  { %558 = dma.done.wait [#allocation8], 2048  }
  0x36   :  { %559 = vsyncadd [#allocation8], 4294965248  ;;  %v567_v0 = vmov 0.0   ;;  %vm568_vm0 = vmmov 0   ;;  %v443_v1 = vld [vmem:[#allocation9] sm:$0xff]   ;;  %v444_v2 = vld [vmem:[#allocation9 + $0x8] sm:$0xff]  }
  0x37   :  { %413 = vmatprep.subr.bf16.mxu1 %v567_v0  ;;  %393 = vmatprep.subr.bf16.mxu0 %v567_v0  ;;  %v445_v3 = vld [vmem:[#allocation9 + $0x10] sm:$0xff]   ;;  %v450_v4 = vld [vmem:[#allocation7] sm:$0xff]   ;;  %v452_v5 = vld [vmem:[#allocation7 + $0x8] sm:$0xff]   ;;  %s569_s6 = smov [#allocation10]  }
  0x38   :  { %429 = vmatprep.mubr.msk.bf16.mxu1 %vm568_vm0, %v567_v0  ;;  %409 = vmatprep.mubr.msk.bf16.mxu0 %vm568_vm0, %v567_v0  ;;  %v446_v6 = vld [vmem:[#allocation9 + $0x18] sm:$0xff]   ;;  %v454_v7 = vld [vmem:[#allocation7 + $0x10] sm:$0xff]   ;;  %v447_v8 = vld [vmem:[#allocation9 + $0x20] sm:$0xff]   ;;  %s343_s7 = sshll.u32 %s569_s6, 4  ;;  %s344_s7 = int_to_ptr.vmem [resolvable:$true] %s343_s7 }
  0x39   :  { %414 = vmatpush3.bf16.msra.mxu1 %v443_v1  ;;  %394 = vmatpush3.bf16.msra.mxu0 %v450_v4  ;;  %v455_v9 = vld [vmem:[#allocation7 + $0x18] sm:$0xff]   ;;  %v448_v10 = vld [vmem:[#allocation9 + $0x28] sm:$0xff]   ;;  %v456_v11 = vld [vmem:[#allocation7 + $0x20] sm:$0xff]   ;;  %s534_s8 = scalar_lea.vmem %s344_s7, 256  ;;  %p539_p11 = scmp.lt.s32.totalorder %s344_s7, %s344_s7 }
  0x3a   :  { %415 = vmatprep.subr.bf16.mxu1 %v567_v0  ;;  %395 = vmatprep.subr.bf16.mxu0 %v567_v0  ;;  %v449_v12 = vld [vmem:[#allocation9 + $0x30] sm:$0xff]   ;;  %v457_v13 = vld [vmem:[#allocation7 + $0x28] sm:$0xff]   ;;  %v451_v14 = vld [vmem:[#allocation9 + $0x38] sm:$0xff]   ;;  %p535_p10 = scmp.ne.s32.totalorder %s344_s7, %s534_s8  ;;  %p540_p12 = scmp.lt.s32.totalorder %s534_s8, %s534_s8 }
  0x3b   :  { %v453_v15 = vld [vmem:[#allocation4] sm:$0xff]   ;;  %v458_v16 = vld [vmem:[#allocation7 + $0x30] sm:$0xff]  }
  0x3c   :  { %v459_v17 = vld [vmem:[#allocation7 + $0x38] sm:$0xff]   ;;  %p541_p13 = por %p540_p12, %p539_p11 }
  0x3d   :  { %416 = vmatpush3.bf16.msra.mxu1 %v444_v2  ;;  %396 = vmatpush3.bf16.msra.mxu0 %v452_v5  ;;  %v357_v18 = vld [vmem:[%s676_s4] ss:$0 sm:$0xff] }
  0x3e   :  { %417 = vmatprep.subr.bf16.mxu1 %v567_v0  ;;  %397 = vmatprep.subr.bf16.mxu0 %v567_v0  ;;  %v356_v37 = vld [vmem:[%s675_s3] ss:$0 sm:$0xff]  ;;  %p542_p0 = pnand %p541_p13, %p535_p10 }
  0x41   :  { %418 = vmatpush3.bf16.msra.mxu1 %v445_v3  ;;  %398 = vmatpush3.bf16.msra.mxu0 %v454_v7 }
  0x42   :  { %419 = vmatprep.subr.bf16.mxu1 %v567_v0  ;;  %399 = vmatprep.subr.bf16.mxu0 %v567_v0 }
  0x45   :  { %420 = vmatpush3.bf16.msra.mxu1 %v446_v6  ;;  %400 = vmatpush3.bf16.msra.mxu0 %v455_v9 }
  0x46   :  { %421 = vmatprep.subr.bf16.mxu1 %v567_v0  ;;  %401 = vmatprep.subr.bf16.mxu0 %v567_v0 }
  0x49   :  { %422 = vmatpush3.bf16.msra.mxu1 %v447_v8  ;;  %402 = vmatpush3.bf16.msra.mxu0 %v456_v11 }
  0x4a   :  { %423 = vmatprep.subr.bf16.mxu1 %v567_v0  ;;  %403 = vmatprep.subr.bf16.mxu0 %v567_v0 }
  0x4d   :  { %424 = vmatpush3.bf16.msra.mxu1 %v448_v10  ;;  %404 = vmatpush3.bf16.msra.mxu0 %v457_v13 }
  0x4e   :  { %425 = vmatprep.subr.bf16.mxu1 %v567_v0  ;;  %405 = vmatprep.subr.bf16.mxu0 %v567_v0 }
  0x51   :  { %426 = vmatpush3.bf16.msra.mxu1 %v449_v12  ;;  %406 = vmatpush3.bf16.msra.mxu0 %v458_v16 }
  0x52   :  { %427 = vmatprep.subr.bf16.mxu1 %v567_v0  ;;  %407 = vmatprep.subr.bf16.mxu0 %v567_v0 }
  0x55   :  { %428 = vmatpush3.bf16.msra.mxu1 %v451_v14  ;;  %408 = vmatpush3.bf16.msra.mxu0 %v459_v17 }
  0x58   :  { %430 = vmatmul.mubr.bf16.vlgmr.msra.gmra.mrb[0].mxu1 %v453_v15  ;;  %410 = vmatmul.mubr.bf16.vlgmr.msra.gmra.mrb[0].mxu0 %v453_v15 }
 0x12b   :  { %v304_v19 = vpop.f32.mrb[0].mxu1  ;;  %v193_v29 = vpop.f32.mrb[0].mxu0 }
 0x12c   :  { %v311_v20 = vadd.f32 %v357_v18, %v304_v19  ;;  %v431_v21 = vpop.f32.mrb[1].mxu1  ;;  %v411_v30 = vpop.f32.mrb[1].mxu0  ;;  %v200_v38 = vadd.f32 %v356_v37, %v193_v29 }
 0x12d   :  { %v307_v22 = vpop.f32.mrb[2].mxu1  ;;  %v196_v31 = vpop.f32.mrb[2].mxu0 }
 0x12e   :  { %v322_v23 = vsub.f32 0.0, %v311_v20  ;;  %v312_v24 = vadd.f32 %v357_v18, %v307_v22  ;;  %v432_v25 = vpop.f32.mrb[3].mxu1  ;;  %v412_v32 = vpop.f32.mrb[3].mxu0  ;;  %v201_v44 = vadd.f32 %v356_v37, %v196_v31 }
 0x130   :  { %v324_v26 = vmul.f32 1.442695, %v322_v23  ;;  %v323_v27 = vsub.f32 0.0, %v312_v24 }
 0x132   :  { %460 = vpow2.f32 %v324_v26  ;;  %v326_v28 = vmul.f32 1.442695, %v323_v27 }
 0x134   :  { %462 = vpow2.f32 %v326_v28 }
 0x13c   :  { %v461_v33 = vpop.eup %460 }
 0x13d   :  { %v328_v34 = vadd.f32 1.0, %v461_v33 }
 0x13e   :  { %v463_v35 = vpop.eup %462 }
 0x13f   :  { %464 = vrcp.f32 %v328_v34  ;;  %v329_v36 = vadd.f32 1.0, %v463_v35 }
 0x141   :  { %466 = vrcp.f32 %v329_v36 }
 0x149   :  { %v465_v39 = vpop.eup %464 }
 0x14a   :  { %v332_v40 = vmul.f32 %v465_v39, %v311_v20 }
 0x14b   :  { %v467_v41 = vpop.eup %466 }
 0x14c   :  { %v333_v42 = vmul.f32 %v467_v41, %v312_v24  ;;  %v334_v43 = vmul.f32 %v332_v40, %v200_v38 }
 0x14e   :  { %336 = vst [vmem:[#allocation10] sm:$0xff] %v334_v43  ;;  %v335_v45 = vmul.f32 %v333_v42, %v201_v44 }
 0x150   :  { %337 = vst [vmem:[#allocation10 + $0x8] sm:$0xff] %v335_v45 }
 0x151   :  { %545 = shalt.err (!%p542_p0)
}
 0x152   :  { %s546_s10 = scalar_lea.hbm %s677_s5, 256 }
 0x153   :  { %p547_p1 = scmp.ne.s32.totalorder %s677_s5, %s546_s10  ;;  %p550_p2 = scmp.lt.u32.totalorder %s546_s10, %s677_s5 }
 0x155   :  { %p552_p3 = pnand %p550_p2, %p547_p1 }
 0x157   :  { %555 = shalt.err (!%p552_p3)
}
 0x158   :  { %s570_s15 = smov 128   ;;  %s571_s16 = smov 8  }
 0x159   :  { %349 = dma.vmem_to_hbm [thread:$0]  %s344_s7, 256, %s677_s5, [#allocation6], %s570_s15, %s570_s15, %s571_s16  }
 0x15a   :  { %560 = dma.done.wait [#allocation6], 256  }
 0x15b   :  { %561 = vsyncadd [#allocation6], 4294967040 }
 0x15c   :  { %353 = vsyncpa [#allocation5], 1 }
 0x15d   :  { %354 = vsyncpa [#allocation8], 1 }
 0x15e   :  { %355 = vsyncpa [#allocation6], 1 }

</bundles_post_ra>
